<compile_context>
chip_gen: v7x
topology: tpu7x:2x2x1
jax: 0.10.0
libtpu: 0.0.40
codegen_flags: <defaults>
</compile_context>

<pallas_src>
import jax
import jax.numpy as jnp
from jax.experimental import pallas as pl
from jax.experimental.pallas import tpu as pltpu

_EPS = 1e-5


def _round_up(x, m):
    return ((x + m - 1) // m) * m


def _vmem_capacity_bytes():
    """Physical per-core VMEM; falls back to the most conservative value (v7x)."""
    try:
        cap = int(pltpu.get_tpu_info().vmem_capacity_bytes)
        if cap > 0:
            return cap
    except Exception:
        pass
    return 64 << 20


def _choose_tile_n(n_rows, d, c, itemsize, act_budget):
    """Row-tile size: as large as the activation budget allows (amortizes the
    ~0.35us per-grid-step overhead), capped at 4096 rows, shrunk so there are
    at least two grid steps for megacore sharding on v7x."""
    # Per-row bytes: double-buffered x + out (+ cond) tiles, plus f32 temps
    # (h, emb (2D), centered x, xhat) that live for one grid step.
    per_row = 2 * (2 * d + c) * itemsize + 6 * d * 4
    t = int(act_budget // max(per_row, 1))
    t = max(8, min(t, 4096, _round_up(n_rows, 8)))
    if t >= 128:
        t = (t // 128) * 128          # MXU-friendly M; fine on v5e (128) and v6e/v7x
    else:
        t = max(8, (t // 8) * 8)      # sublane multiple
    if t >= n_rows and n_rows > 8:
        # Keep >= 2 grid steps so the "parallel" axis can span both v7x cores.
        t = max(8, _round_up(-(-n_rows // 2), 8))
    return t


def _modulated_layernorm(x, scale, shift, out_dtype):
    """LayerNorm (elementwise_affine=False, eps=1e-5, biased var) * scale + shift.

    `scale` already contains the +1. Two-pass f32 statistics (mean, then
    centered sum-of-squares) to match torch.nn.LayerNorm numerics.
    """
    xf = x.astype(jnp.float32)
    inv_d = 1.0 / xf.shape[-1]
    mean = jnp.sum(xf, axis=-1, keepdims=True) * inv_d
    xc = xf - mean
    var = jnp.sum(xc * xc, axis=-1, keepdims=True) * inv_d
    xhat = xc * jax.lax.rsqrt(var + _EPS)
    return (xhat * scale + shift).astype(out_dtype)


def _silu_embedding(cond_block, w1_ref, b1_ref):
    # MXU in the operand dtype (bf16-native when activations/weights are bf16),
    # f32 accumulation; sigmoid lowers to the EUP.
    h = jnp.dot(cond_block.astype(w1_ref.dtype), w1_ref[...],
                preferred_element_type=jnp.float32)
    h = h + b1_ref[...]
    return h * jax.nn.sigmoid(h)


def _scale_shift_fused(cond_block, w1_ref, b1_ref, w2_ref, bs_ref, bsh_ref, d):
    h = _silu_embedding(cond_block, w1_ref, b1_ref)
    emb = jnp.dot(h.astype(w2_ref.dtype), w2_ref[...],
                  preferred_element_type=jnp.float32)
    # bs_ref already includes the +1 of (1 + scale); lane-aligned slice (d % 128 == 0).
    return emb[:, :d] + bs_ref[...], emb[:, d:] + bsh_ref[...]


def _scale_shift_split(cond_block, w1_ref, b1_ref, ws_ref, bs_ref, wsh_ref, bsh_ref):
    h = _silu_embedding(cond_block, w1_ref, b1_ref)
    hc = h.astype(ws_ref.dtype)
    scale = jnp.dot(hc, ws_ref[...], preferred_element_type=jnp.float32) + bs_ref[...]
    shift = jnp.dot(hc, wsh_ref[...], preferred_element_type=jnp.float32) + bsh_ref[...]
    return scale, shift


# --- kernels: fused (D % 128 == 0) and split projection, each with a
# --- "self-cond" variant that reuses the x tile when cond is None.

def _ada_ln_fused_kernel(x_ref, cond_ref, w1_ref, b1_ref, w2_ref, bs_ref, bsh_ref, o_ref):
    d = o_ref.shape[-1]
    scale, shift = _scale_shift_fused(cond_ref[...], w1_ref, b1_ref, w2_ref, bs_ref, bsh_ref, d)
    o_ref[...] = _modulated_layernorm(x_ref[...], scale, shift, o_ref.dtype)


def _ada_ln_fused_self_kernel(x_ref, w1_ref, b1_ref, w2_ref, bs_ref, bsh_ref, o_ref):
    d = o_ref.shape[-1]
    xb = x_ref[...]   # single HBM/VMEM load reused for conditioning and LN
    scale, shift = _scale_shift_fused(xb, w1_ref, b1_ref, w2_ref, bs_ref, bsh_ref, d)
    o_ref[...] = _modulated_layernorm(xb, scale, shift, o_ref.dtype)


def _ada_ln_split_kernel(x_ref, cond_ref, w1_ref, b1_ref, ws_ref, bs_ref, wsh_ref, bsh_ref, o_ref):
    scale, shift = _scale_shift_split(cond_ref[...], w1_ref, b1_ref, ws_ref, bs_ref, wsh_ref, bsh_ref)
    o_ref[...] = _modulated_layernorm(x_ref[...], scale, shift, o_ref.dtype)


def _ada_ln_split_self_kernel(x_ref, w1_ref, b1_ref, ws_ref, bs_ref, wsh_ref, bsh_ref, o_ref):
    xb = x_ref[...]
    scale, shift = _scale_shift_split(xb, w1_ref, b1_ref, ws_ref, bs_ref, wsh_ref, bsh_ref)
    o_ref[...] = _modulated_layernorm(xb, scale, shift, o_ref.dtype)


def ada_layer_norm(x, params, cond=None):
    """x: (B, S, D); cond: (B, S, C) or None (then cond := x, requires C == D)."""
    B, S, D = x.shape
    self_cond = cond is None
    C = D if self_cond else cond.shape[-1]
    N = B * S

    w1, b1, w2, b2 = params["w1"], params["b1"], params["w2"], params["b2"]
    assert w1.shape == (C, D) and b1.shape == (1, D)
    assert w2.shape == (D, 2 * D) and b2.shape == (1, 2 * D)
    if not self_cond:
        assert cond.shape[:2] == (B, S)

    cdtype = x.dtype                       # MXU operand dtype (bf16 stays bf16)
    itemsize = jnp.dtype(cdtype).itemsize

    # Weights in activation dtype (fast MXU mode, half the HBM/VMEM when bf16);
    # biases stay f32 (added to f32 accumulators, negligible size).
    w1c = w1.astype(cdtype)
    b1f = b1.astype(jnp.float32)
    b2f = b2.astype(jnp.float32)
    b_scale = b2f[:, :D] + 1.0             # fold the +1 of (1 + scale) into the bias
    b_shift = b2f[:, D:]

    x2 = x.reshape(N, D)
    c2 = None if self_cond else cond.reshape(N, C)

    fused = (D % 128 == 0)
    if fused:
        w2c = w2.astype(cdtype)
        weight_args = (w1c, b1f, w2c, b_scale, b_shift)
    else:
        # Pre-split columns (== torch.chunk(emb, 2, dim=-1)) to avoid
        # non-lane-aligned in-kernel slicing.
        # TODO(synk): for D < 128 the output store is a masked partial-lane vst;
        # a lane-dense repack (128//D rows per lane row) would speed the store path.
        ws = w2[:, :D].astype(cdtype)
        wsh = w2[:, D:].astype(cdtype)
        weight_args = (w1c, b1f, ws, b_scale, wsh, b_shift)

    # --- generation-aware VMEM budgeting -----------------------------------
    vmem_cap = _vmem_capacity_bytes()                       # 64 MiB v7x, 128 MiB v5e/v6e
    w_bytes = sum(int(a.size) * jnp.dtype(a.dtype).itemsize for a in weight_args)
    # Assume constant-index weight blocks may still be double-buffered by the
    # pipeline (conservative) and leave headroom for f32 temporaries.
    act_budget = max(4 << 20, int(vmem_cap * 0.70) - 2 * w_bytes)
    # TODO(synk): for very large D on v7x (64 MiB VMEM) where 2*w_bytes alone
    # nears the budget, stream w2 column tiles over a second grid axis instead
    # of keeping the whole (D, 2D) weight VMEM-resident.

    tile_n = _choose_tile_n(N, D, 0 if self_cond else C, itemsize, act_budget)
    num_tiles = pl.cdiv(N, tile_n)

    act_bytes = 2 * tile_n * (2 * D + (0 if self_cond else C)) * itemsize
    tmp_bytes = tile_n * 6 * D * 4                          # h + emb(2D) + centered/xhat f32
    vmem_limit = 2 * w_bytes + act_bytes + tmp_bytes + (4 << 20)
    vmem_limit = int(min(max(vmem_limit, 32 << 20), (vmem_cap * 9) // 10))

    cp = pltpu.CompilerParams(
        dimension_semantics=("parallel",),   # megacore sharding on v7x; harmless elsewhere
        vmem_limit_bytes=vmem_limit,
    )

    # Row-tiled activations; D stays the lane dimension so the output store is a
    # full-lane vst whenever D >= 128. Weights/biases use constant block indices
    # -> fetched once, VMEM-resident across grid steps.
    row_spec = lambda cols: pl.BlockSpec((tile_n, cols), lambda i: (i, 0))
    const_spec = lambda shape: pl.BlockSpec(shape, lambda i: (0, 0))

    if fused:
        kernel = _ada_ln_fused_self_kernel if self_cond else _ada_ln_fused_kernel
        w_specs = [const_spec((C, D)), const_spec((1, D)),
                   const_spec((D, 2 * D)), const_spec((1, D)), const_spec((1, D))]
    else:
        kernel = _ada_ln_split_self_kernel if self_cond else _ada_ln_split_kernel
        w_specs = [const_spec((C, D)), const_spec((1, D)),
                   const_spec((D, D)), const_spec((1, D)),
                   const_spec((D, D)), const_spec((1, D))]

    if self_cond:
        in_specs = [row_spec(D)] + w_specs
        args = (x2,) + weight_args
    else:
        in_specs = [row_spec(D), row_spec(C)] + w_specs
        args = (x2, c2) + weight_args

    out = pl.pallas_call(
        kernel,
        out_shape=jax.ShapeDtypeStruct((N, D), x.dtype),
        grid=(num_tiles,),                   # tail block is partial; store is masked
        in_specs=in_specs,
        out_specs=row_spec(D),
        compiler_params=cp,
    )(*args)

    return out.reshape(B, S, D)


def init_params(key, embedding_dim, cond_dim):
    k1, k2, k3, k4 = jax.random.split(key, 4)
    # Stored as (in, out) so the kernel does cond @ W + b (synthetic init,
    # equivalent up to transpose of PyTorch's (out, in) weight layout).
    w1 = jax.random.normal(k1, (cond_dim, embedding_dim), jnp.float32) * 0.05
    b1 = jax.random.normal(k2, (1, embedding_dim), jnp.float32) * 0.05
    w2 = jax.random.normal(k3, (embedding_dim, 2 * embedding_dim), jnp.float32) * 0.05
    b2 = jax.random.normal(k4, (1, 2 * embedding_dim), jnp.float32) * 0.05
    return {"w1": w1, "b1": b1, "w2": w2, "b2": b2}


def _reference(x, params, cond=None):
    if cond is None:
        cond = x
    x = x.astype(jnp.float32)
    cond = cond.astype(jnp.float32)
    h = cond @ params["w1"] + params["b1"]
    h = h * jax.nn.sigmoid(h)
    emb = h @ params["w2"] + params["b2"]
    D = x.shape[-1]
    scale, shift = emb[..., :D], emb[..., D:]
    mean = jnp.mean(x, axis=-1, keepdims=True)
    var = jnp.mean((x - mean) ** 2, axis=-1, keepdims=True)
    xhat = (x - mean) * jax.lax.rsqrt(var + _EPS)
    return xhat * (1.0 + scale) + shift


if __name__ == "__main__":
    key = jax.random.PRNGKey(0)
    kx, kc, kp, kq, kr = jax.random.split(key, 5)

    # Case 1: lane-aligned D -> fused (D, 2D) projection path.
    B, S, D, C = 2, 8, 128, 64
    x = jax.random.normal(kx, (B, S, D), jnp.float32)
    cond = jax.random.normal(kc, (B, S, C), jnp.float32)
    params = init_params(kp, D, C)
    out = jax.block_until_ready(ada_layer_norm(x, params, cond))
    ref = _reference(x, params, cond)
    assert out.shape == (B, S, D)
    assert jnp.allclose(out, ref, atol=1e-4, rtol=1e-4), "mismatch vs reference (fused)"

    # Case 2: cond=None path (self-cond kernel; x read once, C == D).
    params_sq = init_params(jax.random.PRNGKey(1), D, D)
    out2 = jax.block_until_ready(ada_layer_norm(x, params_sq, None))
    ref2 = _reference(x, params_sq, None)
    assert jnp.allclose(out2, ref2, atol=1e-4, rtol=1e-4), "mismatch vs reference (cond=None)"

    # Case 3: non-128-aligned D exercises the split (two-matmul) fallback.
    B3, S3, D3, C3 = 2, 8, 32, 16
    x3 = jax.random.normal(kq, (B3, S3, D3), jnp.float32)
    cond3 = jax.random.normal(kc, (B3, S3, C3), jnp.float32)
    params3 = init_params(jax.random.PRNGKey(2), D3, C3)
    out3 = jax.block_until_ready(ada_layer_norm(x3, params3, cond3))
    ref3 = _reference(x3, params3, cond3)
    assert jnp.allclose(out3, ref3, atol=1e-4, rtol=1e-4), "mismatch vs reference (split)"

    # Case 4: N not divisible by tile_n -> partial tail block (no wrapper pad).
    B4, S4 = 2, 9
    x4 = jax.random.normal(kr, (B4, S4, D), jnp.float32)
    cond4 = jax.random.normal(kc, (B4, S4, C), jnp.float32)
    out4 = jax.block_until_ready(ada_layer_norm(x4, params, cond4))
    ref4 = _reference(x4, params, cond4)
    assert out4.shape == (B4, S4, D)
    assert jnp.allclose(out4, ref4, atol=1e-4, rtol=1e-4), "mismatch vs reference (partial tail)"

    # Case 5: bf16 activations -> bf16 weights / bf16xbf16 MXU (loose tolerance).
    xb = x.astype(jnp.bfloat16)
    cb = cond.astype(jnp.bfloat16)
    out5 = jax.block_until_ready(ada_layer_norm(xb, params, cb))
    ref5 = _reference(xb, params, cb)
    assert out5.dtype == jnp.bfloat16
    assert jnp.allclose(out5.astype(jnp.float32), ref5, atol=1e-1, rtol=1e-1), \
        "mismatch vs reference (bf16)"

    print("KERNEL_OK")
</pallas_src>

<mosaic_0001>
module attributes {stable_mosaic.version = 11 : i64} {
  func.func @_ada_ln_fused_kernel(%arg0: i32, %arg1: memref<8x128xf32, #tpu.memory_space<vmem>>, %arg2: memref<8x64xf32, #tpu.memory_space<vmem>>, %arg3: memref<64x128xf32, #tpu.memory_space<vmem>>, %arg4: memref<1x128xf32, #tpu.memory_space<vmem>>, %arg5: memref<128x256xf32, #tpu.memory_space<vmem>>, %arg6: memref<1x128xf32, #tpu.memory_space<vmem>>, %arg7: memref<1x128xf32, #tpu.memory_space<vmem>>, %arg8: memref<8x128xf32, #tpu.memory_space<vmem>>) attributes {dimension_semantics = [#tpu.dimension_semantics<parallel>], iteration_bounds = array<i64: 2>, scalar_prefetch = 0 : i64, scratch_operands = 0 : i64, tpu.core_type = #tpu.core_type<tc>, window_params = [{transform_indices = @transform_0, window_bounds = array<i64: 8, 128>}, {transform_indices = @transform_1, window_bounds = array<i64: 8, 64>}, {pipeline_mode = #tpu.pipeline_mode<synchronous>, transform_indices = @transform_2, window_bounds = array<i64: 64, 128>}, {pipeline_mode = #tpu.pipeline_mode<synchronous>, transform_indices = @transform_3, window_bounds = array<i64: 1, 128>}, {pipeline_mode = #tpu.pipeline_mode<synchronous>, transform_indices = @transform_4, window_bounds = array<i64: 128, 256>}, {pipeline_mode = #tpu.pipeline_mode<synchronous>, transform_indices = @transform_5, window_bounds = array<i64: 1, 128>}, {pipeline_mode = #tpu.pipeline_mode<synchronous>, transform_indices = @transform_6, window_bounds = array<i64: 1, 128>}, {transform_indices = @transform_7, window_bounds = array<i64: 8, 128>}]} {
    %c0 = arith.constant 0 : index
    %c0_0 = arith.constant 0 : index
    %0 = vector.load %arg2[%c0, %c0_0] : memref<8x64xf32, #tpu.memory_space<vmem>>, vector<8x64xf32>
    %c0_1 = arith.constant 0 : index
    %c0_2 = arith.constant 0 : index
    %1 = vector.load %arg3[%c0_1, %c0_2] : memref<64x128xf32, #tpu.memory_space<vmem>>, vector<64x128xf32>
    %cst = arith.constant dense<0.000000e+00> : vector<8x128xf32>
    %2 = tpu.matmul %0, %1, %cst {dimension_numbers = #tpu.dot_dimension_numbers<[1], [0], [0], [1], [0, 0, 1, 1], [], []>} : vector<8x64xf32>, vector<64x128xf32>, vector<8x128xf32> -> vector<8x128xf32>
    %c0_3 = arith.constant 0 : index
    %c0_4 = arith.constant 0 : index
    %3 = vector.load %arg4[%c0_3, %c0_4] : memref<1x128xf32, #tpu.memory_space<vmem>>, vector<1x128xf32>
    %4 = vector.broadcast %3 : vector<1x128xf32> to vector<8x128xf32>
    %5 = arith.addf %2, %4 : vector<8x128xf32>
    %6 = arith.negf %5 : vector<8x128xf32>
    %7 = math.exp %6 : vector<8x128xf32>
    %cst_5 = arith.constant 1.000000e+00 : f32
    %8 = vector.broadcast %cst_5 : f32 to vector<8x128xf32>
    %9 = arith.addf %8, %7 : vector<8x128xf32>
    %10 = arith.divf %8, %9 : vector<8x128xf32>
    %11 = arith.mulf %5, %10 : vector<8x128xf32>
    %c0_6 = arith.constant 0 : index
    %c0_7 = arith.constant 0 : index
    %12 = vector.load %arg5[%c0_6, %c0_7] : memref<128x256xf32, #tpu.memory_space<vmem>>, vector<128x256xf32>
    %cst_8 = arith.constant dense<0.000000e+00> : vector<8x256xf32>
    %13 = tpu.matmul %11, %12, %cst_8 {dimension_numbers = #tpu.dot_dimension_numbers<[1], [0], [0], [1], [0, 0, 1, 1], [], []>} : vector<8x128xf32>, vector<128x256xf32>, vector<8x256xf32> -> vector<8x256xf32>
    %14 = vector.extract_strided_slice %13 {offsets = [0, 0], sizes = [8, 128], strides = [1, 1]} : vector<8x256xf32> to vector<8x128xf32>
    %c0_9 = arith.constant 0 : index
    %c0_10 = arith.constant 0 : index
    %15 = vector.load %arg6[%c0_9, %c0_10] : memref<1x128xf32, #tpu.memory_space<vmem>>, vector<1x128xf32>
    %16 = vector.broadcast %15 : vector<1x128xf32> to vector<8x128xf32>
    %17 = arith.addf %14, %16 : vector<8x128xf32>
    %18 = vector.extract_strided_slice %13 {offsets = [0, 128], sizes = [8, 128], strides = [1, 1]} : vector<8x256xf32> to vector<8x128xf32>
    %c0_11 = arith.constant 0 : index
    %c0_12 = arith.constant 0 : index
    %19 = vector.load %arg7[%c0_11, %c0_12] : memref<1x128xf32, #tpu.memory_space<vmem>>, vector<1x128xf32>
    %20 = vector.broadcast %19 : vector<1x128xf32> to vector<8x128xf32>
    %21 = arith.addf %18, %20 : vector<8x128xf32>
    %c0_13 = arith.constant 0 : index
    %c0_14 = arith.constant 0 : index
    %22 = vector.load %arg1[%c0_13, %c0_14] : memref<8x128xf32, #tpu.memory_space<vmem>>, vector<8x128xf32>
    %cst_15 = arith.constant dense<0.000000e+00> : vector<8xf32>
    %23 = vector.multi_reduction <add>, %22, %cst_15 [1] : vector<8x128xf32> to vector<8xf32>
    %24 = vector.shape_cast %23 : vector<8xf32> to vector<8x1xf32>
    %cst_16 = arith.constant 7.812500e-03 : f32
    %25 = vector.broadcast %cst_16 : f32 to vector<8x1xf32>
    %26 = arith.mulf %24, %25 : vector<8x1xf32>
    %27 = vector.broadcast %26 : vector<8x1xf32> to vector<8x128xf32>
    %28 = arith.subf %22, %27 : vector<8x128xf32>
    %29 = arith.mulf %28, %28 : vector<8x128xf32>
    %cst_17 = arith.constant dense<0.000000e+00> : vector<8xf32>
    %30 = vector.multi_reduction <add>, %29, %cst_17 [1] : vector<8x128xf32> to vector<8xf32>
    %31 = vector.shape_cast %30 : vector<8xf32> to vector<8x1xf32>
    %cst_18 = arith.constant 7.812500e-03 : f32
    %32 = vector.broadcast %cst_18 : f32 to vector<8x1xf32>
    %33 = arith.mulf %31, %32 : vector<8x1xf32>
    %cst_19 = arith.constant 9.99999974E-6 : f32
    %34 = vector.broadcast %cst_19 : f32 to vector<8x1xf32>
    %35 = arith.addf %33, %34 : vector<8x1xf32>
    %36 = math.rsqrt %35 : vector<8x1xf32>
    %37 = vector.broadcast %36 : vector<8x1xf32> to vector<8x128xf32>
    %38 = arith.mulf %28, %37 : vector<8x128xf32>
    %39 = arith.mulf %38, %17 : vector<8x128xf32>
    %40 = arith.addf %39, %21 : vector<8x128xf32>
    %c0_20 = arith.constant 0 : index
    %c0_21 = arith.constant 0 : index
    %41 = vector.load %arg8[%c0_20, %c0_21] : memref<8x128xf32, #tpu.memory_space<vmem>>, vector<8x128xf32>
    tpu.vector_store %arg8[%c0_20, %c0_21], %40 {strides = array<i32>} : memref<8x128xf32, #tpu.memory_space<vmem>>, vector<8x128xf32>,
    return
  }
  func.func @transform_0(%arg0: i32) -> (i32, i32) {
    %c0_i32 = arith.constant 0 : i32
    %c0_i32_0 = arith.constant 0 : i32
    return %arg0, %c0_i32 : i32, i32
  }
  func.func @transform_1(%arg0: i32) -> (i32, i32) {
    %c0_i32 = arith.constant 0 : i32
    %c0_i32_0 = arith.constant 0 : i32
    return %arg0, %c0_i32 : i32, i32
  }
  func.func @transform_2(%arg0: i32) -> (i32, i32) {
    %c0_i32 = arith.constant 0 : i32
    %c0_i32_0 = arith.constant 0 : i32
    %c0_i32_1 = arith.constant 0 : i32
    return %c0_i32, %c0_i32_0 : i32, i32
  }
  func.func @transform_3(%arg0: i32) -> (i32, i32) {
    %c0_i32 = arith.constant 0 : i32
    %c0_i32_0 = arith.constant 0 : i32
    %c0_i32_1 = arith.constant 0 : i32
    return %c0_i32, %c0_i32_0 : i32, i32
  }
  func.func @transform_4(%arg0: i32) -> (i32, i32) {
    %c0_i32 = arith.constant 0 : i32
    %c0_i32_0 = arith.constant 0 : i32
    %c0_i32_1 = arith.constant 0 : i32
    return %c0_i32, %c0_i32_0 : i32, i32
  }
  func.func @transform_5(%arg0: i32) -> (i32, i32) {
    %c0_i32 = arith.constant 0 : i32
    %c0_i32_0 = arith.constant 0 : i32
    %c0_i32_1 = arith.constant 0 : i32
    return %c0_i32, %c0_i32_0 : i32, i32
  }
  func.func @transform_6(%arg0: i32) -> (i32, i32) {
    %c0_i32 = arith.constant 0 : i32
    %c0_i32_0 = arith.constant 0 : i32
    %c0_i32_1 = arith.constant 0 : i32
    return %c0_i32, %c0_i32_0 : i32, i32
  }
  func.func @transform_7(%arg0: i32) -> (i32, i32) {
    %c0_i32 = arith.constant 0 : i32
    %c0_i32_0 = arith.constant 0 : i32
    return %arg0, %c0_i32 : i32, i32
  }
}

</mosaic_0001>

<bundles_post_ra>
// kernel: tpu_custom_call.1
= control target key start
LH: loop header
LB: loop body
LE: loop exit
PB: predicated region body
PF: predicated region fallthrough
CT: control target
= control target key end

     0   :  { %s1435_s0 = inlined_call_operand.hbm [shape: f32[16,128], index: 0, kind: input, shape index: {}]   ;;  %s1436_s1 = inlined_call_operand.hbm [shape: f32[16,64], index: 1, kind: input, shape index: {}]   ;;  %s1437_s2 = inlined_call_operand.hbm [shape: f32[64,128], index: 2, kind: input, shape index: {}]   ;;  %s1438_s3 = inlined_call_operand.vmem [shape: f32[1,128], index: 3, kind: input, shape index: {}]   ;;  %s1439_s4 = inlined_call_operand.hbm [shape: f32[128,256], index: 4, kind: input, shape index: {}]   ;;  %s1440_s5 = inlined_call_operand.vmem [shape: f32[1,128], index: 5, kind: input, shape index: {}]   ;;  %s1441_s6 = inlined_call_operand.vmem [shape: f32[1,128], index: 6, kind: input, shape index: {}]   ;;  %s1442_s7 = inlined_call_operand.hbm [shape: f32[16,128], index: 7, kind: output, shape index: {}]  }
   0x1   :  { %1448 = sst [smem:[#allocation18_spill]] %s1437_s2 }
   0x2   :  { %1449 = sst [smem:[#allocation19_spill]] %s1439_s4 }
   0x3   :  { %12 = vsyncpa [#allocation3], 0 }
   0x4   :  { %14 = vsyncpa [#allocation3 + $0x1], 0 }
   0x5   :  { %15 = vsyncpa [#allocation6], 0 }
   0x6   :  { %17 = vsyncpa [#allocation6 + $0x1], 0 }
   0x7   :  { %18 = vsyncpa [#allocation9], 0 }
   0x8   :  { %19 = vsyncpa [#allocation4], 0 }
   0x9   :  { %21 = vsyncpa [#allocation4 + $0x1], 0  ;;  %s1146_s24 = smov 0   ;;  %s1148_s25 = smov 0  }
   0xa   :  { %s1150_s26 = smov 0   ;;  %s1152_s27 = smov 0  }
   0xb LB: > { %1450 = sst [smem:[#allocation16_spill]] %s1088_s26  ;;  %s1167_s28 = sadd.s32 4294967295, %s1092_s27   ;;  %s1092_s27 = sphi %s1152_s27, %s1475_s27   ;;  %s1088_s26 = sphi %s1150_s26, %s1474_s26   ;;  %s1084_s25 = sphi %s1148_s25, %s1473_s25   ;;  %s1080_s24 = sphi %s1146_s24, %s1472_s24  }
   0xc   : > { %s717_s29 = sadd.s32 4294967294, %s1092_s27   ;;  %p47_p0 = scmp.ne.s32.totalorder %s1084_s25, %s1080_s24 }
   0xd   : > { %p1443_p1 = scmp.eq.s32.totalorder %s1167_s28, 0  ;;  %p208_p3 = scmp.eq.s32.totalorder %s717_s29, 1 }
   0xe   : > { %p718_p5 = scmp.ge.s32.totalorder %s1092_s27, 1  ;;  %p215_p7 = scmp.lt.s32.totalorder %s1092_s27, 3 }
   0xf   : > { %p1176_p4 = por %p1443_p1, %p47_p0  ;;  %p1181_p6 = por %p208_p3, %p47_p0 }
  0x10   : > { %p1186_p8 = pnand %p718_p5, %p215_p7  ;;  %s1094_s10 = smov [#allocation7]  }
  0x11   : > { %s1451_s30 = scalar_select %p1176_p4, 1, 0 }
  0x12   : > { %s1452_s8 = scalar_select %p1181_p6, 1, 0 }
  0x13   : > { %s1453_s9 = scalar_select %p1186_p8, 1, 0 }
  0x14   : > { %s227_s11 = sshll.u32 %s1094_s10, 4  ;;  %p827_p9 = pneg %p1186_p8  ;;  %s1190_s11 = int_to_ptr.vmem [resolvable:$true] %s227_s11 }
  0x15   : > { %s1095_s13 = smov [#allocation8]   ;;  %s1455_s2 = sld [smem:[#allocation18_spill]] }
  0x16   : > { %p1197_p11 = pnand %p827_p9, %p1443_p1  ;;  %s243_s14 = sshll.u32 %s1095_s13, 4  ;;  %s1201_s14 = int_to_ptr.vmem [resolvable:$true] %s243_s14 }
  0x18   : > { %p900_p13 = pneg %p1197_p11 }
  0x1b   : > { %s898_s17 = scalar_lea.hbm %s1455_s2, 1024 }
  0x1c   : > { %p899_p12 = scmp.ne.s32.totalorder %s1455_s2, %s898_s17  ;;  %p905_p5 = scmp.lt.u32.totalorder %s898_s17, %s1455_s2 }
  0x1e   : > { %p901_p0 = pnand %p900_p13, %p899_p12 }
  0x20   : > { %p902_p3 = pneg %p901_p0 }
  0x22   : > { %p907_p7 = pnand %p905_p5, %p902_p3 }
  0x24   : > { %910 = shalt.err (!%p907_p7)
}
  0x25   : > { %s911_s22 = scalar_lea.vmem %s1190_s11, 1024  ;;  %p919_p2 = scmp.lt.s32.totalorder %s1190_s11, %s1190_s11 }
  0x26   : > { %p912_p9 = scmp.ne.s32.totalorder %s1190_s11, %s911_s22  ;;  %p920_p12 = scmp.lt.s32.totalorder %s911_s22, %s911_s22 }
  0x28   : > { %p914_p10 = pnand %p912_p9, %p900_p13  ;;  %p921_p0 = por %p920_p12, %p919_p2 }
  0x2a   : > { %p915_p1 = pneg %p914_p10 }
  0x2c   : > { %p922_p6 = pnand %p921_p0, %p915_p1 }
  0x2e   : > { %925 = shalt.err (!%p922_p6)
}
  0x2f   : > { %s1096_s23 = smov 128   ;;  %s1097_s29 = smov 8  }
  0x30   : > { %830 = dma.hbm_to_vmem [thread:$0]  (!%p1197_p11), %s1455_s2, 1024, %s1190_s11, [#allocation6], %s1096_s23, %s1096_s23, %s1097_s29  }
  0x31   : > { %s1456_s4 = sld [smem:[#allocation19_spill]] }
  0x37   : > { %s926_s17 = scalar_lea.hbm %s1456_s4, 4096 }
  0x38   : > { %p927_p2 = scmp.ne.s32.totalorder %s1456_s4, %s926_s17  ;;  %p933_p10 = scmp.lt.u32.totalorder %s926_s17, %s1456_s4 }
  0x3a   : > { %p929_p1 = pnand %p927_p2, %p900_p13 }
  0x3c   : > { %p930_p6 = pneg %p929_p1 }
  0x3e   : > { %p935_p3 = pnand %p933_p10, %p930_p6 }
  0x40   : > { %938 = shalt.err (!%p935_p3)
}
  0x41   : > { %s939_s11 = scalar_lea.vmem %s1201_s14, 4096  ;;  %p947_p12 = scmp.lt.s32.totalorder %s1201_s14, %s1201_s14 }
  0x42   : > { %p940_p5 = scmp.ne.s32.totalorder %s1201_s14, %s939_s11  ;;  %p948_p0 = scmp.lt.s32.totalorder %s939_s11, %s939_s11 }
  0x44   : > { %p942_p7 = pnand %p940_p5, %p900_p13  ;;  %p949_p2 = por %p948_p0, %p947_p12 }
  0x46   : > { %p943_p9 = pneg %p942_p7 }
  0x48   : > { %p950_p1 = pnand %p949_p2, %p943_p9 }
  0x4a   : > { %953 = shalt.err (!%p950_p1)
}
  0x4b   : > { %s1098_s22 = smov 256   ;;  %s1099_s23 = smov 16  }
  0x4c   : > { %833 = dma.hbm_to_vmem [thread:$0]  (!%p1197_p11), %s1456_s4, 4096, %s1201_s14, [#allocation9], %s1098_s22, %s1098_s22, %s1099_s23  }
  0x4d   : > { %s1256_s13 = sadd.s32 1, %s1092_s27   ;;  %s34_s16 = sadd.s32 1, %s1088_s26 }
  0x4e   : > { %s31_s15 = ssub.s32 %s1092_s27, %s1256_s13  ;;  %p41_p6 = scmp.ne.s32.totalorder %s1088_s26, %s1084_s25 }
  0x4f   : > { %p32_p13 = scmp.eq.s32.totalorder %s31_s15, 0  ;;  %p42_p10 = scmp.eq.s32.totalorder %s1092_s27, 0 }
  0x50   : > { %p1458_p5 = scmp.eq.s32.totalorder %s1167_s28, 1  ;;  %p847_p9 = scmp.lt.s32.totalorder %s1092_s27, 2 }
  0x51   : > { %s1265_s17 = scalar_select %p32_p13, %s1088_s26, %s34_s16  }
  0x52   : > { %p43_p3 = por %p42_p10, %p41_p6  ;;  %p1269_p7 = por %p1458_p5, %p41_p6 }
  0x53   : > { %1457 = sst [smem:[#allocation17_spill]] %s1265_s17  ;;  %s263_s12 = sand.u32 1, %s1088_s26  }
  0x54   : > { %s1459_s18 = scalar_select %p1269_p7, 1, 0 }
  0x55   : > { %s1275_s14 = sshll.u32 %s263_s12, 3  ;;  %s723_s19 = sshll.u32 %s1092_s27, 7 }
  0x56   : > { %s1281_s11 = scalar_lea.hbm %s1435_s0, %s723_s19  ;;  %s267_s22 = scalar_lea.vmem [#allocation2], %s1275_s14 }
  0x57   : > { %s274_s23 = sshll.u32 %s267_s22, 4  ;;  %p1286_p11 = pnand %p847_p9, %p43_p3  ;;  %s1284_s23 = int_to_ptr.vmem [resolvable:$true] %s274_s23 }
  0x58   : > { %s1293_s16 = scalar_lea.hbm %s1436_s1, %s723_s19  ;;  %s281_s20 = sand.u32 1, %s1092_s27  }
  0x59   : > { %s264_s21 = scalar_lea.sflag [#allocation3], %s263_s12  ;;  %s954_s2 = scalar_lea.hbm %s1281_s11, 128 }
  0x5a   : > { %p955_p12 = scmp.ne.s32.totalorder %s1281_s11, %s954_s2  ;;  %p956_p0 = pneg %p1286_p11 }
  0x5b   : > { %s959_s17 = scalar_lea.hbm %s1435_s0, 256  ;;  %p960_p13 = scmp.lt.u32.totalorder %s1281_s11, %s1435_s0 }
  0x5c   : > { %p957_p2 = pnand %p956_p0, %p955_p12  ;;  %p961_p6 = scmp.lt.u32.totalorder %s959_s17, %s954_s2 }
  0x5d   : > { %p963_p3 = scmp.lt.u32.totalorder %s954_s2, %s1281_s11 }
  0x5e   : > { %p958_p1 = pneg %p957_p2  ;;  %p962_p10 = por %p961_p6, %p960_p13 }
  0x60   : > { %p964_p5 = por %p963_p3, %p962_p10 }
  0x62   : > { %p965_p9 = pnand %p964_p5, %p958_p1 }
  0x64   : > { %968 = shalt.err (!%p965_p9)
}
  0x65   : > { %s969_s12 = scalar_lea.vmem %s1284_s23, 128  ;;  %s1100_s4 = smov [#allocation2]  }
  0x66   : > { %p970_p12 = scmp.ne.s32.totalorder %s1284_s23, %s969_s12  ;;  %s974_s19 = sshll.u32 %s1100_s4, 4  ;;  %s975_s19 = int_to_ptr.vmem [resolvable:$false] %s974_s19 }
  0x67   : > { %s976_s26 = scalar_lea.vmem %s975_s19, 256  ;;  %p977_p4 = scmp.lt.s32.totalorder %s1284_s23, %s975_s19 }
  0x68   : > { %p972_p2 = pnand %p970_p12, %p956_p0  ;;  %p978_p13 = scmp.lt.s32.totalorder %s976_s26, %s969_s12 }
  0x6a   : > { %p973_p7 = pneg %p972_p2  ;;  %p979_p6 = por %p978_p13, %p977_p4 }
  0x6c   : > { %p980_p10 = pnand %p979_p6, %p973_p7 }
  0x6e   : > { %983 = shalt.err (!%p980_p10)
}
  0x6f   : > { %837 = dma.hbm_to_vmem [thread:$0]  (!%p1286_p11), %s1281_s11, 128, %s1284_s23, %s264_s21  }
  0x70   : > { %s285_s2 = scalar_lea.vmem [#allocation5], %s1275_s14  ;;  %s282_s15 = scalar_lea.sflag [#allocation6], %s281_s20 }
  0x71   : > { %s292_s17 = sshll.u32 %s285_s2, 4  ;;  %s984_s22 = scalar_lea.hbm %s1293_s16, 128  ;;  %s293_s17 = int_to_ptr.vmem [resolvable:$true] %s292_s17 }
  0x72   : > { %p985_p4 = scmp.ne.s32.totalorder %s1293_s16, %s984_s22  ;;  %s989_s4 = scalar_lea.hbm %s1436_s1, 256 }
  0x73   : > { %p990_p3 = scmp.lt.u32.totalorder %s1293_s16, %s1436_s1  ;;  %p991_p5 = scmp.lt.u32.totalorder %s989_s4, %s984_s22 }
  0x74   : > { %p987_p7 = pnand %p985_p4, %p956_p0  ;;  %p993_p12 = scmp.lt.u32.totalorder %s984_s22, %s1293_s16 }
  0x75   : > { %p992_p9 = por %p991_p5, %p990_p3 }
  0x76   : > { %p988_p1 = pneg %p987_p7 }
  0x77   : > { %p994_p2 = por %p993_p12, %p992_p9 }
  0x79   : > { %p995_p13 = pnand %p994_p2, %p988_p1 }
  0x7b   : > { %998 = shalt.err (!%p995_p13)
}
  0x7c   : > { %s999_s14 = scalar_lea.vmem %s293_s17, 128  ;;  %s1101_s11 = smov [#allocation5]  }
  0x7d   : > { %p1000_p6 = scmp.ne.s32.totalorder %s293_s17, %s999_s14  ;;  %s1004_s23 = sshll.u32 %s1101_s11, 4  ;;  %s1005_s23 = int_to_ptr.vmem [resolvable:$false] %s1004_s23 }
  0x7e   : > { %s1006_s20 = scalar_lea.vmem %s1005_s23, 256  ;;  %p1007_p7 = scmp.lt.s32.totalorder %s293_s17, %s1005_s23 }
  0x7f   : > { %p1002_p10 = pnand %p1000_p6, %p956_p0  ;;  %p1008_p8 = scmp.lt.s32.totalorder %s1006_s20, %s999_s14 }
  0x81   : > { %p1003_p4 = pneg %p1002_p10  ;;  %p1009_p3 = por %p1008_p8, %p1007_p7 }
  0x83   : > { %p1010_p5 = pnand %p1009_p3, %p1003_p4 }
  0x85   : > { %1013 = shalt.err (!%p1010_p5)
}
  0x86   : > { %840 = dma.hbm_to_vmem [thread:$0]  (!%p1286_p11), %s1293_s16, 128, %s293_s17, %s282_s15  }
  0x87   : > { %p1461_p1 = scmp.ne.s32.totalorder %s1453_s9, 0 }
  0x88   : > { %s1346_s21 = sand.u32 (!%p1461_p1), 1, %s1084_s25   ;;  %p1462_p8 = scmp.ne.s32.totalorder (!%p1461_p1), %s1451_s30, 0 }
  0x89   : > { %301 = sbr.rel (%p1461_p1) target bundleno = 648 (0x288), region = 48  ;;  %s1349_s2 = sshll.u32 (!%p1461_p1), %s1346_s21, 3 }
  0x8a   : > { %s304_s22 = scalar_lea.sflag (!%p1461_p1), [#allocation3], %s1346_s21  ;;  %s307_s10 = scalar_lea.vmem (!%p1461_p1), [#allocation2], %s1349_s2 }
  0x90   : > { %1059 = dma.done.wait (%p1462_p8), %s304_s22, 128  }
  0x91   : > { %1061 = vsyncadd (%p1462_p8), %s304_s22, 4294967168  ;;  %s312_s9 = sand.u32 1, %s1167_s28   ;;  %s316_s16 = scalar_lea.vmem [#allocation5], %s1349_s2 }
  0x92   : > { %s313_s29 = scalar_lea.sflag [#allocation6], %s312_s9 }
  0x93   : > { %1063 = dma.done.wait (%p1462_p8), %s313_s29, 128  }
  0x94   : > { %1065 = vsyncadd (%p1462_p8), %s313_s29, 4294967168  ;;  %p1463_p11 = scmp.eq.s32.totalorder %s1167_s28, 0 }
  0x96   : > { %1067 = dma.done.wait (%p1463_p11), [#allocation6], 1024   ;;  %p1464_p0 = pmov %p1463_p11 }
  0x98   : > { %1069 = vsyncadd (%p1464_p0), [#allocation6], 4294966272  ;;  %p1465_p9 = pmov %p1464_p0 }
  0x99   : > { %p1466_p12 = pmov %p1464_p0 }
  0x9a   : > { %1071 = dma.done.wait (%p1465_p9), [#allocation9], 4096  }
  0x9b   : > { %1073 = vsyncadd (%p1466_p12), [#allocation9], 4294963200  ;;  %v1102_v0 = vmov 0.0|0.0   ;;  %vm1103_vm0 = vmmov 0   ;;  %v1104_v1 = vmov 0.0   ;;  %v361_v2 = vld [vmem:[#allocation7] sm:$0xff] }
  0x9c   : > { %769 = vmatprep.subr.bf16.mxu0 %v1102_v0  ;;  %766 = vmatprep.mubr.msk.f32.mxu0 %vm1103_vm0, %v1104_v1  ;;  %v362_v3 = vld [vmem:[#allocation7 + $0x8] sm:$0xff]  ;;  %v363_v4 = vld [vmem:[#allocation7 + $0x10] sm:$0xff]  ;;  %v364_v6 = vld [vmem:[#allocation7 + $0x18] sm:$0xff]  ;;  %vm376_vm1 = vcmask 523264   ;;  %s738_s26 = sshll.u32 %s1167_s28, 7  ;;  %s359_s14 = scalar_lea.vmem [#allocation10], %s1349_s2 }
  0x9d   : > { %553 = vmatprep.mubr.f32.mxu1 %v1104_v1  ;;  %v770_v5 = vpack.c.bf16 %v362_v3, %v361_v2  ;;  %v1371_v7 = vld [vmem:[%s307_s10] sm:$0xff]  ;;  %v773_v8 = vpack.c.bf16 %v364_v6, %v363_v4  ;;  %v367_v12 = vld [vmem:[#allocation7 + $0x30] sm:$0xff]  ;;  %v368_v13 = vld [vmem:[#allocation7 + $0x38] sm:$0xff]  ;;  %s605_s11 = sshll.u32 %s359_s14, 4  ;;  %s1391_s22 = scalar_lea.hbm %s1442_s7, %s738_s26  ;;  %s1393_s11 = int_to_ptr.vmem [resolvable:$true] %s605_s11 }
  0x9e   : > { %577 = vadd.xlane.f32.xlu0 %v1371_v7  ;;  %v365_v9 = vld [vmem:[#allocation7 + $0x20] sm:$0xff]  ;;  %v366_v10 = vld [vmem:[#allocation7 + $0x28] sm:$0xff]  ;;  %v779_v14 = vpack.c.bf16 %v368_v13, %v367_v12  ;;  %v360_v15 = vld [vmem:[%s316_s16] sm:$0xff]  ;;  %s592_s10 = scalar_lea.sflag [#allocation4], %s1346_s21  ;;  %s1014_s9 = scalar_lea.vmem %s1393_s11, 128 }
  0x9f   : > { %771 = vmatpush3.bf16.msra.mxu0 %v770_v5  ;;  %v776_v11 = vpack.c.bf16 %v366_v10, %v365_v9  ;;  %v458_v16 = vld [vmem:[#allocation8 + $0x8] sm:$0xff]  ;;  %v460_v17 = vld [vmem:[#allocation8 + $0x18] sm:$0xff]  ;;  %v457_v19 = vld [vmem:[#allocation8] sm:$0xff]  ;;  %p1015_p2 = scmp.ne.s32.totalorder %s1393_s11, %s1014_s9  ;;  %p1467_p13 = scmp.ne.s32.totalorder %s1459_s18, 0 }
  0xa0   : > { %772 = vmatprep.subr.bf16.mxu0 %v1102_v0  ;;  %v781_v18 = vpack.c.bf16 %v460_v17, %v458_v16  ;;  %v459_v20 = vld [vmem:[#allocation8 + $0x10] sm:$0xff]  ;;  %v462_v22 = vld [vmem:[#allocation8 + $0x28] sm:$0xff]  ;;  %v464_v23 = vld [vmem:[#allocation8 + $0x38] sm:$0xff]  ;;  %s1105_s28 = smov [#allocation10]  }
  0xa1   : > { %v783_v21 = vpack.c.bf16 %v459_v20, %v457_v19  ;;  %v785_v24 = vpack.c.bf16 %v464_v23, %v462_v22  ;;  %v461_v25 = vld [vmem:[#allocation8 + $0x20] sm:$0xff]  ;;  %v463_v26 = vld [vmem:[#allocation8 + $0x30] sm:$0xff]  ;;  %v466_v28 = vld [vmem:[#allocation8 + $0x48] sm:$0xff]  ;;  %p1016_p6 = pnand %p1015_p2, %p1467_p13  ;;  %s1018_s2 = sshll.u32 %s1105_s28, 4  ;;  %s1019_s2 = int_to_ptr.vmem [resolvable:$false] %s1018_s2 }
  0xa2   : > { %782 = vmatprep.subr.bf16.mxu1 %v781_v18  ;;  %v787_v27 = vpack.c.bf16 %v463_v26, %v461_v25  ;;  %v468_v29 = vld [vmem:[#allocation8 + $0x58] sm:$0xff]  ;;  %v465_v31 = vld [vmem:[#allocation8 + $0x40] sm:$0xff]  ;;  %v467_v32 = vld [vmem:[#allocation8 + $0x50] sm:$0xff]  ;;  %s1020_s29 = scalar_lea.vmem %s1019_s2, 256  ;;  %p1021_p4 = scmp.lt.s32.totalorder %s1393_s11, %s1019_s2 }
  0xa3   : > { %774 = vmatpush3.bf16.msra.mxu0 %v773_v8  ;;  %784 = vmatpush1.bf16.msra.mxu1 %v783_v21  ;;  %v789_v30 = vpack.c.bf16 %v468_v29, %v466_v28  ;;  %v791_v33 = vpack.c.bf16 %v467_v32, %v465_v31  ;;  %v470_v34 = vld [vmem:[#allocation8 + $0x68] sm:$0xff]  ;;  %v472_v35 = vld [vmem:[#allocation8 + $0x78] sm:$0xff]  ;;  %v469_v37 = vld [vmem:[#allocation8 + $0x60] sm:$0xff]  ;;  %p1017_p10 = pneg %p1016_p6  ;;  %p1022_p7 = scmp.lt.s32.totalorder %s1020_s29, %s1014_s9 }
  0xa4   : > { %775 = vmatprep.subr.bf16.mxu0 %v1102_v0  ;;  %786 = vmatprep.subr.bf16.mxu1 %v785_v24  ;;  %v793_v36 = vpack.c.bf16 %v472_v35, %v470_v34  ;;  %v471_v38 = vld [vmem:[#allocation8 + $0x70] sm:$0xff]  ;;  %v474_v40 = vld [vmem:[#allocation8 + $0x88] sm:$0xff]  ;;  %v476_v41 = vld [vmem:[#allocation8 + $0x98] sm:$0xff] }
  0xa5   : > { %v795_v39 = vpack.c.bf16 %v471_v38, %v469_v37  ;;  %v797_v42 = vpack.c.bf16 %v476_v41, %v474_v40  ;;  %v473_v43 = vld [vmem:[#allocation8 + $0x80] sm:$0xff]  ;;  %v475_v44 = vld [vmem:[#allocation8 + $0x90] sm:$0xff]  ;;  %v478_v46 = vld [vmem:[#allocation8 + $0xa8] sm:$0xff]  ;;  %p1023_p3 = por %p1022_p7, %p1021_p4 }
  0xa6   : > { %v799_v45 = vpack.c.bf16 %v475_v44, %v473_v43  ;;  %v480_v47 = vld [vmem:[#allocation8 + $0xb8] sm:$0xff]  ;;  %v477_v49 = vld [vmem:[#allocation8 + $0xa0] sm:$0xff]  ;;  %v479_v50 = vld [vmem:[#allocation8 + $0xb0] sm:$0xff] }
  0xa7   : > { %777 = vmatpush3.bf16.msra.mxu0 %v776_v11  ;;  %788 = vmatpush1.bf16.msra.mxu1 %v787_v27  ;;  %v801_v48 = vpack.c.bf16 %v480_v47, %v478_v46  ;;  %v803_v51 = vpack.c.bf16 %v479_v50, %v477_v49  ;;  %v482_v52 = vld [vmem:[#allocation8 + $0xc8] sm:$0xff]  ;;  %v484_v53 = vld [vmem:[#allocation8 + $0xd8] sm:$0xff]  ;;  %v481_v55 = vld [vmem:[#allocation8 + $0xc0] sm:$0xff]  ;;  %p1024_p5 = pnand %p1023_p3, %p1017_p10 }
  0xa8   : > { %778 = vmatprep.subr.bf16.mxu0 %v1102_v0  ;;  %790 = vmatprep.subr.bf16.mxu1 %v789_v30  ;;  %v805_v54 = vpack.c.bf16 %v484_v53, %v482_v52  ;;  %v483_v56 = vld [vmem:[#allocation8 + $0xd0] sm:$0xff]  ;;  %v486_v58 = vld [vmem:[#allocation8 + $0xe8] sm:$0xff]  ;;  %v488_v59 = vld [vmem:[#allocation8 + $0xf8] sm:$0xff] }
  0xa9   : > { %v807_v57 = vpack.c.bf16 %v483_v56, %v481_v55  ;;  %v809_v60 = vpack.c.bf16 %v488_v59, %v486_v58  ;;  %v485_v61 = vld [vmem:[#allocation8 + $0xe0] sm:$0xff]  ;;  %v487_v62 = vld [vmem:[#allocation8 + $0xf0] sm:$0xff] }
  0xaa   : > { %v811_v63 = vpack.c.bf16 %v487_v62, %v485_v61  ;;  %v732_v4 = vld [vmem:[%s1438_s3] ss:$0 sm:$0xff] }
  0xab   : > { %780 = vmatpush3.bf16.msra.mxu0 %v779_v14  ;;  %792 = vmatpush1.bf16.msra.mxu1 %v791_v33  ;;  %v735_v17 = vld [vmem:[%s1440_s5] ss:$0 sm:$0xff] }
  0xac   : > { %794 = vmatprep.subr.bf16.mxu1 %v793_v36  ;;  %v736_v18 = vld [vmem:[%s1441_s6] ss:$0 sm:$0xff] }
  0xae   : > { %767 = vmatmul.mubr.msk.f32.vlgmr.msra.gmra.mrb[0].mxu0 %vm376_vm1, %v360_v15 }
  0xaf   : > { %796 = vmatpush1.bf16.msra.mxu1 %v795_v39 }
  0xb0   : > { %798 = vmatprep.subr.bf16.mxu1 %v797_v42 }
  0xb3   : > { %800 = vmatpush1.bf16.msra.mxu1 %v799_v45 }
  0xb4   : > { %802 = vmatprep.subr.bf16.mxu1 %v801_v48 }
  0xb7   : > { %804 = vmatpush1.bf16.msra.mxu1 %v803_v51 }
  0xb8   : > { %806 = vmatprep.subr.bf16.mxu1 %v805_v54 }
  0xbb   : > { %808 = vmatpush1.bf16.msra.mxu1 %v807_v57 }
  0xbc   : > { %810 = vmatprep.subr.bf16.mxu1 %v809_v60 }
  0xbf   : > { %812 = vmatpush1.bf16.msra.mxu1 %v811_v63 }
 0x12b   : > { %v578_v0 = vpop.xlane.xlu0 %577 }
 0x12c   : > { %v579_v1 = vmul.f32 0.0078125, %v578_v0 }
 0x12e   : > { %v580_v2 = vsub.f32 %v1371_v7, %v579_v1 }
 0x130   : > { %v581_v3 = vmul.f32 %v580_v2, %v580_v2 }
 0x132   : > { %582 = vadd.xlane.f32.xlu0 %v581_v3 }
 0x181   : > { %v446_v5 = vpop.f32.mrb[0].mxu0 }
 0x182   : > { %v447_v6 = vadd.f32 %v732_v4, %v446_v5  ;;  %v768_v8 = vpop.f32.mrb[1].mxu0 }
 0x184   : > { %v734_v9 = vmul.f32 -1.442695, %v447_v6 }
 0x186   : > { %892 = vpow2.f32 %v734_v9 }
 0x190   : > { %v893_v10 = vpop.eup %892 }
 0x191   : > { %v453_v11 = vadd.f32 1.0, %v893_v10 }
 0x193   : > { %894 = vrcp.f32 %v453_v11 }
 0x19d   : > { %v895_v12 = vpop.eup %894 }
 0x19e   : > { %v456_v13 = vmul.f32 %v895_v12, %v447_v6 }
 0x1a0   : > { %554 = vmatmul.mubr.f32.vlgmr.msra.gmra.mrb[0].mxu1 %v456_v13 }
 0x1bf   : > { %v583_v7 = vpop.xlane.xlu0 %582 }
 0x1c0   : > { %v584_v14 = vmul.f32 0.0078125, %v583_v7 }
 0x1c2   : > { %v585_v15 = vadd.f32 1e-05, %v584_v14 }
 0x1c4   : > { %896 = vrsqrt.f32 %v585_v15 }
 0x1ce   : > { %v897_v16 = vpop.eup %896 }
 0x1cf   : > { %v587_v21 = vmul.f32 %v897_v16, %v580_v2 }
 0x273   : > { %v555_v19 = vpop.f32.mrb[0].mxu1 }
 0x274   : > { %v567_v20 = vadd.f32 %v735_v17, %v555_v19  ;;  %v557_v22 = vpop.f32.mrb[1].mxu1 }
 0x275   : > { %v575_v23 = vadd.f32 %v736_v18, %v557_v22 }
 0x276   : > { %v588_v24 = vmul.f32 %v587_v21, %v567_v20 }
 0x278   : > { %v589_v25 = vadd.f32 %v588_v24, %v575_v23 }
 0x27a   : > { %590 = vst [vmem:[%s359_s14] sm:$0xff] %v589_v25 }
 0x27b   : > { %1027 = shalt.err (!%p1024_p5)
}
 0x27c   : > { %s1028_s21 = scalar_lea.hbm %s1391_s22, 128  ;;  %s1032_s17 = scalar_lea.hbm %s1442_s7, 256 }
 0x27d   : > { %p1029_p1 = scmp.ne.s32.totalorder %s1391_s22, %s1028_s21  ;;  %p1033_p0 = scmp.lt.u32.totalorder %s1391_s22, %s1442_s7 }
 0x27e   : > { %p1034_p9 = scmp.lt.u32.totalorder %s1032_s17, %s1028_s21  ;;  %p1036_p2 = scmp.lt.u32.totalorder %s1028_s21, %s1391_s22 }
 0x27f   : > { %p1030_p8 = pnand %p1029_p1, %p1467_p13 }
 0x280   : > { %p1035_p12 = por %p1034_p9, %p1033_p0 }
 0x281   : > { %p1031_p11 = pneg %p1030_p8 }
 0x282   : > { %p1037_p6 = por %p1036_p2, %p1035_p12 }
 0x284   : > { %p1038_p10 = pnand %p1037_p6, %p1031_p11 }
 0x286   : > { %1041 = shalt.err (!%p1038_p10)
}
 0x287   : > { %825 = dma.vmem_to_hbm [thread:$0]  (%p1467_p13), %s1393_s11, 128, %s1391_s22, %s592_s10  }
 0x288 PF: > { %s617_s4 = sand.u32 1, %s1080_s24   ;;  %p1468_p4 = scmp.ne.s32.totalorder %s1452_s8, 0 }
 0x289   : > { %p1469_p7 = scmp.ge.s32.totalorder %s1092_s27, 2  ;;  %s618_s19 = scalar_lea.sflag [#allocation4], %s617_s4 }
 0x28b   : > { %p842_p3 = pnand %p1469_p7, %p1468_p4 }
 0x28d   : > { %1075 = dma.done.wait (!%p842_p3), %s618_s19, 128  }
 0x28e   : > { %1077 = vsyncadd (!%p842_p3), %s618_s19, 4294967168  ;;  %s1470_s26 = sld [smem:[#allocation16_spill]]  ;;  %s1471_s14 = sld [smem:[#allocation17_spill]] }
 0x28f   : > { %p24_p5 = scmp.ge.s32.totalorder %s1256_s13, 4   ;;  %s1472_s24 = smov %s1084_s25 }
 0x290   : > { %s1475_s27 = smov %s1256_s13 }
 0x291   :  { %26 = sbr.rel (!%p24_p5) target bundleno = 11 (0xb), region = 114 }
 0x294   : > { %s1473_s25 = smov %s1470_s26  ;;  %s1474_s26 = smov %s1471_s14 }
 0x298   :  { %623 = vsyncpa [#allocation3], 1 }
 0x299   :  { %625 = vsyncpa [#allocation3 + $0x1], 1 }
 0x29a   :  { %626 = vsyncpa [#allocation6], 1 }
 0x29b   :  { %628 = vsyncpa [#allocation6 + $0x1], 1 }
 0x29c   :  { %629 = vsyncpa [#allocation9], 1 }
 0x29d   :  { %630 = vsyncpa [#allocation4], 1 }
 0x29e   :  { %632 = vsyncpa [#allocation4 + $0x1], 1 }

</bundles_post_ra>
